<compile_context>
chip_gen: v7x
topology: tpu7x:2x2x1
jax: 0.10.0
libtpu: 0.0.40
codegen_flags: <defaults>
</compile_context>

<pallas_src>
import jax
import jax.numpy as jnp
from jax import lax
from jax.experimental import pallas as pl
from jax.experimental.pallas import tpu as pltpu


def _pick_tile(n, candidates=(512, 256, 128)):
    """Largest candidate tile that evenly divides n, else the full extent."""
    for t in candidates:
        if n >= t and n % t == 0:
            return t
    return n


# ---------------------------------------------------------------------------
# Stage 1: linear transform  dep = x @ w_t   (w_t = W.T, shape [E, D])
# ---------------------------------------------------------------------------
def _linear_kernel(x_ref, w_ref, dep_ref, acc_ref):
    # x_ref: (TI, TK)  w_ref: (TK, D)  dep_ref: (TI, D)  acc_ref: (TI, D) f32
    k = pl.program_id(2)

    @pl.when(k == 0)
    def _init():
        acc_ref[...] = jnp.zeros_like(acc_ref)

    acc_ref[...] += jnp.dot(x_ref[...], w_ref[...],
                            preferred_element_type=jnp.float32)

    @pl.when(k == pl.num_programs(2) - 1)
    def _finalize():
        dep_ref[...] = acc_ref[...].astype(dep_ref.dtype)


def _linear_transform(x, w_t, *, ti, tk):
    B, L, E = x.shape
    D = w_t.shape[1]
    return pl.pallas_call(
        _linear_kernel,
        out_shape=jax.ShapeDtypeStruct((B, L, D), x.dtype),
        grid=(B, L // ti, E // tk),
        in_specs=[
            # Batch dim squeezed -> kernel works on clean 2-D tiles.
            pl.BlockSpec((None, ti, tk), lambda b, i, k: (b, i, k)),
            pl.BlockSpec((tk, D), lambda b, i, k: (k, 0)),
        ],
        out_specs=pl.BlockSpec((None, ti, D), lambda b, i, k: (b, i, 0)),
        scratch_shapes=[pltpu.VMEM((ti, D), jnp.float32)],
        compiler_params=pltpu.CompilerParams(
            dimension_semantics=("parallel", "parallel", "arbitrary")),
    )(x, w_t)


# ---------------------------------------------------------------------------
# Stage 2: pairwise squared L2 distances via the Gram-matrix identity.
# ---------------------------------------------------------------------------
def _distance_kernel(dep_i_ref, dep_j_ref, dist_ref):
    di = dep_i_ref[...].astype(jnp.float32)    # (TI, D)
    dj = dep_j_ref[...].astype(jnp.float32)    # (TJ, D)

    # MXU contraction over the feature dim; no transposed copy is materialized.
    g = lax.dot_general(di, dj,
                        dimension_numbers=(((1,), (1,)), ((), ())),
                        preferred_element_type=jnp.float32)       # (TI, TJ)

    sq_i = jnp.sum(di * di, axis=-1, keepdims=True)               # (TI, 1)
    sq_j = jnp.sum(dj * dj, axis=-1)                              # (TJ,)

    dist = sq_i + sq_j[None, :] - 2.0 * g
    # Cancellation can leave tiny negatives (incl. the diagonal); clamp to 0.
    dist_ref[...] = jnp.maximum(dist, 0.0).astype(dist_ref.dtype)


def _pairwise_distances(dep, *, ti, tj):
    B, L, D = dep.shape
    return pl.pallas_call(
        _distance_kernel,
        out_shape=jax.ShapeDtypeStruct((B, L, L), dep.dtype),
        grid=(B, L // ti, L // tj),
        in_specs=[
            pl.BlockSpec((None, ti, D), lambda b, i, j: (b, i, 0)),
            pl.BlockSpec((None, tj, D), lambda b, i, j: (b, j, 0)),
        ],
        out_specs=pl.BlockSpec((None, ti, tj), lambda b, i, j: (b, i, j)),
        compiler_params=pltpu.CompilerParams(
            dimension_semantics=("parallel", "parallel", "parallel")),
    )(dep, dep)


def undirected_graph_predictor(emb_sentences, w_t):
    """emb_sentences: [B, L, E]; w_t: [E, D] (= W.T of the nn.Linear weight)."""
    B, L, E = emb_sentences.shape
    ti = _pick_tile(L)   # row tile of the L x L distance matrix
    tj = _pick_tile(L)   # col tile (lane axis of the output; 128-multiple when L allows)
    tk = _pick_tile(E)   # contraction tile of the linear transform
    dep = _linear_transform(emb_sentences, w_t, ti=ti, tk=tk)
    dist = _pairwise_distances(dep, ti=ti, tj=tj)
    return dep, dist


# TODO(synk): `to_edges` (greedy Prim-style MST with data-dependent Python loops
# and list mutation) has no clean Pallas equivalent and is not part of forward();
# it is intentionally not implemented.


if __name__ == "__main__":
    B, L, E, D = 2, 8, 32, 16   # batch, max_len, embedding_dim, output_dim

    key = jax.random.PRNGKey(0)
    kx, kw = jax.random.split(key)

    emb_sentences = jax.random.normal(kx, (B, L, E), dtype=jnp.float32)
    # Deterministic init of the nn.Linear weight W: [out_dim, emb_dim].
    W = jax.random.normal(kw, (D, E), dtype=jnp.float32) * (1.0 / jnp.sqrt(E))
    w_t = W.T  # [E, D] fed to the kernels

    dep, dist = undirected_graph_predictor(emb_sentences, w_t)
    dep = jax.block_until_ready(dep)
    dist = jax.block_until_ready(dist)

    # Pure-JAX reference check (difference form, matching the PyTorch module).
    dep_ref = jnp.einsum("ble,ed->bld", emb_sentences, w_t)
    diffs_ref = dep_ref[:, :, None, :] - dep_ref[:, None, :, :]
    dist_ref = jnp.sum(diffs_ref ** 2, axis=-1)

    assert dep.shape == (B, L, D) and dist.shape == (B, L, L)
    assert jnp.allclose(dep, dep_ref, atol=1e-4, rtol=1e-4)
    assert jnp.allclose(dist, dist_ref, atol=1e-3, rtol=1e-3)

    print("KERNEL_OK")
</pallas_src>

<mosaic_0001>
module attributes {stable_mosaic.version = 11 : i64} {
  func.func @_linear_kernel(%arg0: i32, %arg1: i32, %arg2: i32, %arg3: memref<1x8x32xf32, #tpu.memory_space<vmem>>, %arg4: memref<32x16xf32, #tpu.memory_space<vmem>>, %arg5: memref<1x8x16xf32, #tpu.memory_space<vmem>>, %arg6: memref<8x16xf32, #tpu.memory_space<vmem>>) attributes {dimension_semantics = [#tpu.dimension_semantics<parallel>, #tpu.dimension_semantics<parallel>, #tpu.dimension_semantics<arbitrary>], iteration_bounds = array<i64: 2, 1, 1>, scalar_prefetch = 0 : i64, scratch_operands = 1 : i64, tpu.core_type = #tpu.core_type<tc>, window_params = [{transform_indices = @transform_0, window_bounds = array<i64: 1, 8, 32>}, {transform_indices = @transform_1, window_bounds = array<i64: 32, 16>}, {transform_indices = @transform_2, window_bounds = array<i64: 1, 8, 16>}]} {
    %c0_i32 = arith.constant 0 : i32
    %0 = arith.cmpi eq, %arg2, %c0_i32 : i32
    %1 = arith.extui %0 : i1 to i32
    %c0_i32_0 = arith.constant 0 : i32
    %2 = arith.cmpi ne, %1, %c0_i32_0 : i32
    scf.if %2 {
      %cst_11 = arith.constant 0.000000e+00 : f32
      %13 = vector.broadcast %cst_11 : f32 to vector<8x16xf32>
      %c0_12 = arith.constant 0 : index
      %c0_13 = arith.constant 0 : index
      %14 = vector.load %arg6[%c0_12, %c0_13] : memref<8x16xf32, #tpu.memory_space<vmem>>, vector<8x16xf32>
      tpu.vector_store %arg6[%c0_12, %c0_13], %13 {strides = array<i32>} : memref<8x16xf32, #tpu.memory_space<vmem>>, vector<8x16xf32>,
    } else {
    }
    %c0 = arith.constant 0 : index
    %c0_1 = arith.constant 0 : index
    %3 = vector.load %arg6[%c0, %c0_1] : memref<8x16xf32, #tpu.memory_space<vmem>>, vector<8x16xf32>
    %c0_2 = arith.constant 0 : index
    %c0_3 = arith.constant 0 : index
    %c0_4 = arith.constant 0 : index
    %4 = vector.load %arg3[%c0_2, %c0_3, %c0_4] : memref<1x8x32xf32, #tpu.memory_space<vmem>>, vector<1x8x32xf32>
    %5 = vector.shape_cast %4 : vector<1x8x32xf32> to vector<8x32xf32>
    %c0_5 = arith.constant 0 : index
    %c0_6 = arith.constant 0 : index
    %6 = vector.load %arg4[%c0_5, %c0_6] : memref<32x16xf32, #tpu.memory_space<vmem>>, vector<32x16xf32>
    %cst = arith.constant dense<0.000000e+00> : vector<8x16xf32>
    %7 = tpu.matmul %5, %6, %cst {dimension_numbers = #tpu.dot_dimension_numbers<[1], [0], [0], [1], [0, 0, 1, 1], [], []>} : vector<8x32xf32>, vector<32x16xf32>, vector<8x16xf32> -> vector<8x16xf32>
    %8 = arith.addf %3, %7 : vector<8x16xf32>
    %c0_7 = arith.constant 0 : index
    %c0_8 = arith.constant 0 : index
    %9 = vector.load %arg6[%c0_7, %c0_8] : memref<8x16xf32, #tpu.memory_space<vmem>>, vector<8x16xf32>
    tpu.vector_store %arg6[%c0_7, %c0_8], %8 {strides = array<i32>} : memref<8x16xf32, #tpu.memory_space<vmem>>, vector<8x16xf32>,
    %c0_i32_9 = arith.constant 0 : i32
    %10 = arith.cmpi eq, %arg2, %c0_i32_9 : i32
    %11 = arith.extui %10 : i1 to i32
    %c0_i32_10 = arith.constant 0 : i32
    %12 = arith.cmpi ne, %11, %c0_i32_10 : i32
    scf.if %12 {
      %c0_11 = arith.constant 0 : index
      %c0_12 = arith.constant 0 : index
      %13 = vector.load %arg6[%c0_11, %c0_12] : memref<8x16xf32, #tpu.memory_space<vmem>>, vector<8x16xf32>
      %c0_13 = arith.constant 0 : index
      %c0_14 = arith.constant 0 : index
      %c0_15 = arith.constant 0 : index
      %14 = vector.load %arg5[%c0_13, %c0_14, %c0_15] : memref<1x8x16xf32, #tpu.memory_space<vmem>>, vector<1x8x16xf32>
      %15 = vector.shape_cast %14 : vector<1x8x16xf32> to vector<8x16xf32>
      %16 = vector.shape_cast %13 : vector<8x16xf32> to vector<1x8x16xf32>
      tpu.vector_store %arg5[%c0_13, %c0_14, %c0_15], %16 {strides = array<i32>} : memref<1x8x16xf32, #tpu.memory_space<vmem>>, vector<1x8x16xf32>,
    } else {
    }
    return
  }
  func.func @transform_0(%arg0: i32, %arg1: i32, %arg2: i32) -> (i32, i32, i32) {
    %c0_i32 = arith.constant 0 : i32
    return %arg0, %arg1, %arg2 : i32, i32, i32
  }
  func.func @transform_1(%arg0: i32, %arg1: i32, %arg2: i32) -> (i32, i32) {
    %c0_i32 = arith.constant 0 : i32
    %c0_i32_0 = arith.constant 0 : i32
    return %arg2, %c0_i32 : i32, i32
  }
  func.func @transform_2(%arg0: i32, %arg1: i32, %arg2: i32) -> (i32, i32, i32) {
    %c0_i32 = arith.constant 0 : i32
    %c0_i32_0 = arith.constant 0 : i32
    return %arg0, %arg1, %c0_i32 : i32, i32, i32
  }
}

</mosaic_0001>

<bundles_post_ra>
// kernel: tpu_custom_call.1
= control target key start
LH: loop header
LB: loop body
LE: loop exit
PB: predicated region body
PF: predicated region fallthrough
CT: control target
= control target key end

     0   :  { %7 = vsyncpa [#allocation4], 0  ;;  %s724_s0 = inlined_call_operand.vmem [shape: f32[2,8,32], index: 0, kind: input, shape index: {}]   ;;  %s725_s1 = inlined_call_operand.vmem [shape: f32[32,16], index: 1, kind: input, shape index: {}]   ;;  %s726_s2 = inlined_call_operand.hbm [shape: f32[2,8,16], index: 2, kind: output, shape index: {}]  }
   0x1   :  { %9 = vsyncpa [#allocation4 + $0x1], 0  ;;  %s597_s9 = smov 0   ;;  %s599_s10 = smov 0  }
   0x2   :  { %s601_s11 = smov 0   ;;  %s603_s12 = smov 0  }
   0x3   :  { %s605_s13 = smov 0   ;;  %s607_s14 = smov 0  }
   0x4 LB: > { %s405_s15 = sadd.s32 4294967295, %s576_s14   ;;  %s406_s16 = sadd.s32 4294967294, %s576_s14   ;;  %s576_s14 = sphi %s607_s14, %s15_s14   ;;  %s572_s13 = sphi %s605_s13, %s733_s13   ;;  %s568_s12 = sphi %s603_s12, %s732_s12   ;;  %s564_s11 = sphi %s601_s11, %s731_s11   ;;  %s560_s10 = sphi %s599_s10, %s730_s10   ;;  %s556_s9 = sphi %s597_s9, %s729_s9  }
   0x5   : > { %s34_s17 = sadd.s32 1, %s572_s13  ;;  %s99_s18 = sadd.s32 1, %s564_s11 }
   0x6   : > { %p36_p0 = scmp.ge.s32.totalorder %s34_s17, 2  ;;  %p109_p1 = scmp.ne.s32.totalorder %s564_s11, %s560_s10 }
   0x7   : > { %p110_p2 = scmp.eq.s32.totalorder %s405_s15, 1  ;;  %p115_p3 = scmp.ne.s32.totalorder %s560_s10, %s556_s9 }
   0x8   : > { %s735_s17 = smov (%p36_p0, %s34_s17), 0  ;;  %p116_p5 = scmp.eq.s32.totalorder %s406_s16, 1 }
   0x9   : > { %p637_p4 = por %p110_p2, %p109_p1  ;;  %s94_s20 = ssub.s32 %s572_s13, %s735_s17 }
   0xa   : > { %p410_p6 = scmp.ge.s32.totalorder %s576_s14, 1  ;;  %p97_p7 = scmp.eq.s32.totalorder %s94_s20, 0 }
   0xb   : > { %p644_p8 = por %p116_p5, %p115_p3  ;;  %p156_p9 = scmp.lt.s32.totalorder %s576_s14, 3 }
   0xc   : > { %s650_s22 = scalar_select %p97_p7, %s564_s11, %s99_s18  }
   0xd   : > { %p157_p10 = pnand %p410_p6, %p156_p9 }
   0xe   : > { %v212_v0 = vld [vmem:[%s725_s1] sm:$0xff] (!%p157_p10)  ;;  %v213_v1 = vld [vmem:[%s725_s1 + $0x8] sm:$0xff] (!%p157_p10)  ;;  %v214_v2 = vld [vmem:[%s725_s1 + $0x10] sm:$0xff] (!%p157_p10)  ;;  %vm208_vm0 = vcmask (!%p157_p10), 130048   ;;  %v578_v3 = vmov (!%p157_p10), 0.0|0.0   ;;  %v579_v6 = vmov (!%p157_p10), 0.0  }
   0xf   : > { %160 = sbr.rel (%p157_p10) target bundleno = 263 (0x107), region = 28  ;;  %434 = vmatprep.subr.bf16.mxu0 (!%p157_p10), %v578_v3  ;;  %v435_v4 = vpack.c.bf16 (!%p157_p10), %v213_v1, %v212_v0  ;;  %v215_v5 = vld [vmem:[%s725_s1 + $0x18] sm:$0xff] (!%p157_p10)  ;;  %209 = vst.msk [vmem:[#allocation2] sm:$0xff] (!%p157_p10), %vm208_vm0, %v579_v6  ;;  %p188_p11 = scmp.lt.s32.totalorder (!%p157_p10), %s568_s12, 1  ;;  %vm580_vm1 = vmmov (!%p157_p10), 0   ;;  %vm216_vm2 = vcmask (!%p157_p10), 261120  }
  0x10   : > { %431 = vmatprep.mubr.msk.f32.mxu0 (!%p157_p10), %vm580_vm1, %v579_v6  ;;  %v438_v7 = vpack.c.bf16 (!%p157_p10), %v215_v5, %v214_v2  ;;  %s185_s8 = sand.u32 (!%p157_p10), 1, %s560_s10   ;;  %s415_s16 = sshll.u32 (!%p157_p10), %s568_s12, 7 }
  0x11   : > { %436 = vmatpush3.bf16.msra.mxu0 (!%p157_p10), %v435_v4  ;;  %s411_s15 = sshll.u32 (!%p157_p10), %s185_s8, 3  ;;  %s676_s25 = scalar_lea.hbm (!%p157_p10), %s726_s2, %s415_s16 }
  0x12   : > { %437 = vmatprep.subr.bf16.mxu0 (!%p157_p10), %v578_v3  ;;  %s187_s18 = scalar_lea.vmem (!%p157_p10), [#allocation3], %s411_s15  ;;  %s299_s26 = scalar_lea.sflag (!%p157_p10), [#allocation4], %s185_s8 }
  0x13   : > { %s313_s20 = sshll.u32 (!%p157_p10), %s187_s18, 4  ;;  %s678_s20 = int_to_ptr.vmem [resolvable:$true] %s313_s20 }
  0x14   : > { %s498_s27 = scalar_lea.vmem (!%p157_p10), %s678_s20, 128 }
  0x15   : > { %439 = vmatpush3.bf16.msra.mxu0 (!%p157_p10), %v438_v7  ;;  %p499_p12 = scmp.ne.s32.totalorder (!%p157_p10), %s678_s20, %s498_s27 }
  0x16   : > { %s189_s3 = scalar_select %p188_p11, %s568_s12, 1  ;;  %v210_v9 = vld [vmem:[#allocation2] sm:$0xff] }
  0x17   : > { %p500_p13 = pnand %p499_p12, %p637_p4  ;;  %s581_s12 = smov [#allocation3]  }
  0x18   : > { %s412_s4 = sshll.u32 %s189_s3, 3  ;;  %s502_s28 = sshll.u32 %s581_s12, 4  ;;  %s503_s28 = int_to_ptr.vmem [resolvable:$false] %s502_s28 }
  0x19   : > { %s197_s7 = scalar_lea.vmem %s724_s0, %s412_s4  ;;  %p501_p0 = pneg %p500_p13 }
  0x1a   : > { %v211_v8 = vld [vmem:[%s197_s7] sm:$0xff]  ;;  %s504_s29 = scalar_lea.vmem %s503_s28, 256  ;;  %p505_p1 = scmp.lt.s32.totalorder %s678_s20, %s503_s28 }
  0x1b   : > { %432 = vmatmul.mubr.msk.f32.vlgmr.msra.gmra.mrb[0].mxu0 %vm216_vm2, %v211_v8  ;;  %p506_p2 = scmp.lt.s32.totalorder %s504_s29, %s498_s27 }
  0x1d   : > { %p507_p3 = por %p506_p2, %p505_p1 }
  0x1f   : > { %p508_p5 = pnand %p507_p3, %p501_p0 }
  0xee   : > { %v286_v10 = vpop.f32.mrb[0].mxu0 }
  0xef   : > { %v290_v11 = vadd.f32 %v286_v10, %v210_v9  ;;  %v433_v12 = vpop.f32.mrb[1].mxu0 }
  0xf1   : > { %292 = vst.msk [vmem:[#allocation2] sm:$0xff] %vm208_vm0, %v290_v11 }
  0xf8   : > { %v296_v13 = vld [vmem:[#allocation2] sm:$0xff] }
  0xf9   : > { %297 = vst.msk [vmem:[%s187_s18] sm:$0xff] %vm208_vm0, %v296_v13 }
  0xfa   : > { %511 = shalt.err (!%p508_p5)
}
  0xfb   : > { %s512_s30 = scalar_lea.hbm %s676_s25, 128  ;;  %s516_s5 = scalar_lea.hbm %s726_s2, 256 }
  0xfc   : > { %p513_p6 = scmp.ne.s32.totalorder %s676_s25, %s512_s30  ;;  %p517_p10 = scmp.lt.u32.totalorder %s676_s25, %s726_s2 }
  0xfd   : > { %p518_p11 = scmp.lt.u32.totalorder %s516_s5, %s512_s30  ;;  %p520_p13 = scmp.lt.u32.totalorder %s512_s30, %s676_s25 }
  0xfe   : > { %p514_p7 = pnand %p513_p6, %p637_p4 }
  0xff   : > { %p519_p12 = por %p518_p11, %p517_p10 }
 0x100   : > { %p515_p9 = pneg %p514_p7 }
 0x101   : > { %p521_p0 = por %p520_p13, %p519_p12 }
 0x103   : > { %p522_p1 = pnand %p521_p0, %p515_p9 }
 0x105   : > { %525 = shalt.err (!%p522_p1)
}
 0x106   : > { %440 = dma.vmem_to_hbm [thread:$0]  (%p637_p4), %s678_s20, 128, %s676_s25, %s299_s26  }
 0x107 PF: > { %p446_p2 = scmp.ge.s32.totalorder %s576_s14, 2  ;;  %s325_s8 = sand.u32 1, %s556_s9  }
 0x108   : > { %s326_s15 = scalar_lea.sflag [#allocation4], %s325_s8 }
 0x109   : > { %p443_p3 = pnand %p446_p2, %p644_p8 }
 0x10b   : > { %551 = dma.done.wait (!%p443_p3), %s326_s15, 128  }
 0x10c   : > { %553 = vsyncadd (!%p443_p3), %s326_s15, 4294967168  ;;  %s15_s14 = sadd.s32 1, %s576_s14   ;;  %s729_s9 = smov %s560_s10 }
 0x10d   : > { %p12_p5 = scmp.ge.s32.totalorder %s15_s14, 4   ;;  %s730_s10 = smov %s564_s11 }
 0x10e   : > { %s731_s11 = smov %s650_s22  ;;  %s732_s12 = smov %s572_s13 }
 0x10f   : > { %s733_s13 = smov %s735_s17  ;;  %14 = sbr.rel (!%p12_p5) target bundleno = 4 (0x4), region = 74 }
 0x116   :  { %331 = vsyncpa [#allocation4], 1 }
 0x117   :  { %333 = vsyncpa [#allocation4 + $0x1], 1 }

</bundles_post_ra>
